<compile_context>
chip_gen: v6e
topology: v6e:2x2x1
jax: 0.10.0
libtpu: 0.0.40
codegen_flags: <defaults>
</compile_context>

<pallas_src>
import jax
import jax.numpy as jnp
from jax.experimental import pallas as pl
from jax.experimental.pallas import tpu as pltpu


def _conv_relu_kernel(w_ref, x_ref, o_ref):
    # w_ref: (C_out, K)      K = 9*C_in, full weight matrix, resident each step
    # x_ref: (1, K, TM)      im2col patches for this (image, spatial tile)
    # o_ref: (1, C_out, TM)  lane-dense output tile (TM multiple of 128)
    acc = jnp.dot(w_ref[...], x_ref[0], preferred_element_type=jnp.float32)
    o_ref[0] = jnp.maximum(acc, 0.0).astype(o_ref.dtype)


def _pick_spatial_tile(m, cap=2048):
    """Largest divisor of m that is a multiple of 128 (and <= cap); else m."""
    best = None
    t = 128
    while t <= min(m, cap):
        if m % t == 0:
            best = t
        t += 128
    return best if best is not None else m


def conv_relu(x_nchw, weight_oihw):
    """3x3 conv (stride 1, pad 1, no bias) + ReLU.  NCHW in, NCHW out.

    Args:
      x_nchw:      (N, C_in, H, W)      -- PyTorch NCHW layout
      weight_oihw: (C_out, C_in, 3, 3)  -- PyTorch conv weight layout
    Returns:
      (N, C_out, H, W)
    """
    N, C_in, H, W = x_nchw.shape
    C_out = weight_oihw.shape[0]
    K = 9 * C_in
    M = H * W

    # --- wrapper glue: zero pad + im2col, staying in NCHW (no transposes) ----
    x_pad = jnp.pad(x_nchw, ((0, 0), (0, 0), (1, 1), (1, 1)))
    taps = [x_pad[:, :, kh:kh + H, kw:kw + W]          # each (N, C_in, H, W)
            for kh in range(3) for kw in range(3)]
    # patches[n, ci*9 + kh*3 + kw, h*W + w] = x_pad[n, ci, h+kh, w+kw]
    patches = jnp.stack(taps, axis=2).reshape(N, K, M)
    # Same flattening order as the patches: (C_out, C_in, 3, 3) -> (C_out, 9*C_in)
    w_mat = weight_oihw.reshape(C_out, K)

    tm = _pick_spatial_tile(M)
    grid = (N, M // tm)

    out_flat = pl.pallas_call(
        _conv_relu_kernel,
        out_shape=jax.ShapeDtypeStruct((N, C_out, M), x_nchw.dtype),
        grid_spec=pltpu.PrefetchScalarGridSpec(
            num_scalar_prefetch=0,
            grid=grid,
            in_specs=[
                pl.BlockSpec((C_out, K), lambda n, m: (0, 0)),     # weights resident
                pl.BlockSpec((1, K, tm), lambda n, m: (n, 0, m)),  # im2col patches
            ],
            out_specs=pl.BlockSpec((1, C_out, tm), lambda n, m: (n, 0, m)),
        ),
        compiler_params=pltpu.CompilerParams(
            dimension_semantics=("parallel", "parallel")),
    )(w_mat, patches)

    # Contiguous reshape back to NCHW (no transpose needed).
    return out_flat.reshape(N, C_out, H, W)


def _reference_conv_relu(x_nchw, weight_oihw):
    out = jax.lax.conv_general_dilated(
        x_nchw, weight_oihw,
        window_strides=(1, 1), padding=((1, 1), (1, 1)),
        dimension_numbers=("NCHW", "OIHW", "NCHW"))
    return jnp.maximum(out, 0.0)


if __name__ == "__main__":
    key = jax.random.PRNGKey(0)
    k_x, k_w = jax.random.split(key)

    N, C_in, C_out, H, W = 2, 4, 8, 16, 16
    x = jax.random.normal(k_x, (N, C_in, H, W), dtype=jnp.float32)
    # Deterministic weight init (shape matches nn.Conv2d(num_in, num_out, 3)).
    weight = jax.random.normal(k_w, (C_out, C_in, 3, 3), dtype=jnp.float32) * 0.1

    out = conv_relu(x, weight)
    out = jax.block_until_ready(out)

    ref = _reference_conv_relu(x, weight)
    assert out.shape == (N, C_out, H, W)
    assert jnp.allclose(out, ref, atol=1e-4, rtol=1e-4), "mismatch vs reference conv"

    print("KERNEL_OK")
</pallas_src>

<mosaic_0001>
module attributes {stable_mosaic.version = 11 : i64} {
  func.func @_conv_relu_kernel(%arg0: i32, %arg1: i32, %arg2: memref<8x36xf32, #tpu.memory_space<vmem>>, %arg3: memref<1x36x256xf32, #tpu.memory_space<vmem>>, %arg4: memref<1x8x256xf32, #tpu.memory_space<vmem>>) attributes {dimension_semantics = [#tpu.dimension_semantics<parallel>, #tpu.dimension_semantics<parallel>], iteration_bounds = array<i64: 2, 1>, scalar_prefetch = 0 : i64, scratch_operands = 0 : i64, tpu.core_type = #tpu.core_type<tc>, window_params = [{pipeline_mode = #tpu.pipeline_mode<synchronous>, transform_indices = @transform_0, window_bounds = array<i64: 8, 36>}, {transform_indices = @transform_1, window_bounds = array<i64: 1, 36, 256>}, {transform_indices = @transform_2, window_bounds = array<i64: 1, 8, 256>}]} {
    %c0 = arith.constant 0 : index
    %c0_0 = arith.constant 0 : index
    %0 = vector.load %arg2[%c0, %c0_0] : memref<8x36xf32, #tpu.memory_space<vmem>>, vector<8x36xf32>
    %c0_1 = arith.constant 0 : index
    %c0_2 = arith.constant 0 : index
    %c0_3 = arith.constant 0 : index
    %1 = vector.load %arg3[%c0_1, %c0_2, %c0_3] : memref<1x36x256xf32, #tpu.memory_space<vmem>>, vector<1x36x256xf32>
    %2 = vector.shape_cast %1 : vector<1x36x256xf32> to vector<36x256xf32>
    %cst = arith.constant dense<0.000000e+00> : vector<8x256xf32>
    %3 = tpu.matmul %0, %2, %cst {dimension_numbers = #tpu.dot_dimension_numbers<[1], [0], [0], [1], [0, 0, 1, 1], [], []>} : vector<8x36xf32>, vector<36x256xf32>, vector<8x256xf32> -> vector<8x256xf32>
    %cst_4 = arith.constant 0.000000e+00 : f32
    %4 = vector.broadcast %cst_4 : f32 to vector<8x256xf32>
    %5 = arith.maximumf %3, %4 : vector<8x256xf32>
    %c0_5 = arith.constant 0 : index
    %c0_6 = arith.constant 0 : index
    %c0_7 = arith.constant 0 : index
    %6 = vector.load %arg4[%c0_5, %c0_6, %c0_7] : memref<1x8x256xf32, #tpu.memory_space<vmem>>, vector<1x8x256xf32>
    %7 = vector.shape_cast %6 : vector<1x8x256xf32> to vector<8x256xf32>
    %8 = vector.shape_cast %5 : vector<8x256xf32> to vector<1x8x256xf32>
    tpu.vector_store %arg4[%c0_5, %c0_6, %c0_7], %8 {strides = array<i32>} : memref<1x8x256xf32, #tpu.memory_space<vmem>>, vector<1x8x256xf32>,
    return
  }
  func.func @transform_0(%arg0: i32, %arg1: i32) -> (i32, i32) {
    %c0_i32 = arith.constant 0 : i32
    %c0_i32_0 = arith.constant 0 : i32
    %c0_i32_1 = arith.constant 0 : i32
    return %c0_i32, %c0_i32_0 : i32, i32
  }
  func.func @transform_1(%arg0: i32, %arg1: i32) -> (i32, i32, i32) {
    %c0_i32 = arith.constant 0 : i32
    %c0_i32_0 = arith.constant 0 : i32
    return %arg0, %c0_i32, %arg1 : i32, i32, i32
  }
  func.func @transform_2(%arg0: i32, %arg1: i32) -> (i32, i32, i32) {
    %c0_i32 = arith.constant 0 : i32
    %c0_i32_0 = arith.constant 0 : i32
    return %arg0, %c0_i32, %arg1 : i32, i32, i32
  }
}

</mosaic_0001>

<bundles_post_ra>
// kernel: tpu_custom_call.1
= control target key start
LH: loop header
LB: loop body
LE: loop exit
PB: predicated region body
PF: predicated region fallthrough
CT: control target
= control target key end

     0   :  { %7 = vsyncpa [#allocation3], 0  ;;  %s633_s0 = inlined_call_operand.vmem [shape: f32[8,36], index: 0, kind: input, shape index: {}]   ;;  %s634_s1 = inlined_call_operand.vmem [shape: f32[2,36,256], index: 1, kind: input, shape index: {}]   ;;  %s635_s2 = inlined_call_operand.hbm [shape: f32[2,8,256], index: 2, kind: output, shape index: {}]  }
   0x1   :  { %9 = vsyncpa [#allocation3 + $0x1], 0  ;;  %s531_s9 = smov 0   ;;  %s533_s10 = smov 0  }
   0x2   :  { %s535_s11 = smov 0   ;;  %s537_s12 = smov 0  }
   0x3   :  { %s539_s13 = smov 0   ;;  %s541_s14 = smov 0  }
   0x4 LB: > { %s363_s15 = sadd.s32 4294967295, %s512_s14   ;;  %s364_s16 = sadd.s32 4294967294, %s512_s14   ;;  %s512_s14 = sphi %s541_s14, %s15_s14   ;;  %s508_s13 = sphi %s539_s13, %s642_s13   ;;  %s504_s12 = sphi %s537_s12, %s641_s12   ;;  %s500_s11 = sphi %s535_s11, %s640_s11   ;;  %s496_s10 = sphi %s533_s10, %s639_s10   ;;  %s492_s9 = sphi %s531_s9, %s638_s9  }
   0x5   : > { %s27_s17 = sadd.s32 1, %s508_s13  ;;  %s85_s18 = sadd.s32 1, %s500_s11 }
   0x6   : > { %p29_p0 = scmp.ge.s32.totalorder %s27_s17, 2  ;;  %p95_p1 = scmp.ne.s32.totalorder %s500_s11, %s496_s10 }
   0x7   : > { %p96_p2 = scmp.eq.s32.totalorder %s363_s15, 1  ;;  %p101_p3 = scmp.ne.s32.totalorder %s496_s10, %s492_s9 }
   0x8   : > { %s644_s17 = smov (%p29_p0, %s27_s17), 0  ;;  %p102_p5 = scmp.eq.s32.totalorder %s364_s16, 1 }
   0x9   : > { %p571_p4 = por %p96_p2, %p95_p1  ;;  %s80_s20 = ssub.s32 %s508_s13, %s644_s17 }
   0xa   : > { %p367_p6 = scmp.ge.s32.totalorder %s512_s14, 1  ;;  %p83_p7 = scmp.eq.s32.totalorder %s80_s20, 0 }
   0xb   : > { %p578_p8 = por %p102_p5, %p101_p3  ;;  %p136_p9 = scmp.lt.s32.totalorder %s512_s14, 3 }
   0xc   : > { %s584_s22 = scalar_select %p83_p7, %s500_s11, %s85_s18  }
   0xd   : > { %p137_p10 = pnand %p367_p6, %p136_p9 }
   0xe   : > { %p163_p11 = scmp.lt.s32.totalorder (!%p137_p10), %s504_s12, 1  ;;  %s159_s30 = sand.u32 (!%p137_p10), 1, %s496_s10  }
   0xf   : > { %140 = sbr.rel (%p137_p10) target bundleno = 246 (0xf6), region = 28  ;;  %s368_s3 = sshll.u32 (!%p137_p10), %s159_s30, 4 }
  0x10   : > { %s378_s4 = sshll.u32 (!%p137_p10), %s504_s12, 8  ;;  %s161_s5 = scalar_lea.vmem (!%p137_p10), [#allocation2], %s368_s3 }
  0x11   : > { %s287_s6 = sshll.u32 (!%p137_p10), %s161_s5, 4  ;;  %s285_s15 = scalar_lea.hbm (!%p137_p10), %s635_s2, %s378_s4  ;;  %s288_s6 = int_to_ptr.vmem [resolvable:$true] %s287_s6 }
  0x12   : > { %s271_s16 = scalar_lea.sflag (!%p137_p10), [#allocation3], %s159_s30  ;;  %s436_s18 = scalar_lea.vmem (!%p137_p10), %s288_s6, 256 }
  0x13   : > { %p437_p12 = scmp.ne.s32.totalorder (!%p137_p10), %s288_s6, %s436_s18  ;;  %s515_s20 = smov (!%p137_p10), [#allocation2]  }
  0x14   : > { %v514_v0 = vmov 0.0   ;;  %s164_s23 = scalar_select %p163_p11, %s504_s12, 1  ;;  %vm188_vm0 = vcmask 1043456   ;;  %v173_v11 = vld [vmem:[%s633_s0] sm:$0xff]  ;;  %vm184_vm1 = vcmask 293888  }
  0x15   : > { %259 = vmatprep.mubr.f32.mxu0 %v514_v0  ;;  %p438_p13 = pnand %p437_p12, %p571_p4  ;;  %s440_s12 = sshll.u32 %s515_s20, 4  ;;  %s441_s12 = int_to_ptr.vmem [resolvable:$false] %s440_s12 }
  0x16   : > { %s379_s24 = smul.u32 80, %s164_s23  ;;  %s442_s23 = scalar_lea.vmem %s441_s12, 512 }
  0x17   : > { %p439_p0 = pneg %p438_p13  ;;  %p443_p1 = scmp.lt.s32.totalorder %s288_s6, %s441_s12 }
  0x18   : > { %s170_s27 = scalar_lea.vmem %s634_s1, %s379_s24  ;;  %p444_p2 = scmp.lt.s32.totalorder %s442_s23, %s436_s18 }
  0x19   : > { %v183_v1 = vld [vmem:[%s170_s27 + $0x48] sm:$0xf]  ;;  %v182_v2 = vld [vmem:[%s170_s27 + $0x40] sm:$0xf]  ;;  %v181_v3 = vld [vmem:[%s170_s27 + $0x38] sm:$0xff] }
  0x1a   : > { %370 = vmatprep.subr.msk.mxu0 %vm188_vm0, %v183_v1  ;;  %v180_v4 = vld [vmem:[%s170_s27 + $0x30] sm:$0xff]  ;;  %v179_v5 = vld [vmem:[%s170_s27 + $0x28] sm:$0xff]  ;;  %v178_v6 = vld [vmem:[%s170_s27 + $0x20] sm:$0xff]  ;;  %p445_p3 = por %p444_p2, %p443_p1 }
  0x1b   : > { %371 = vmatpush1.msk.msra.mxu0 %vm188_vm0, %v182_v2  ;;  %v177_v7 = vld [vmem:[%s170_s27 + $0x18] sm:$0xff]  ;;  %v176_v8 = vld [vmem:[%s170_s27 + $0x10] sm:$0xff]  ;;  %v175_v9 = vld [vmem:[%s170_s27 + $0x8] sm:$0xff] }
  0x1c   : > { %219 = vmatprep.subr.mxu0 %v181_v3  ;;  %v174_v10 = vld [vmem:[%s170_s27] sm:$0xff]  ;;  %p446_p5 = pnand %p445_p3, %p439_p0 }
  0x1d   : > { %220 = vmatpush1.msra.mxu0 %v180_v4 }
  0x1e   : > { %221 = vmatprep.subr.mxu0 %v179_v5 }
  0x1f   : > { %222 = vmatpush1.msra.mxu0 %v178_v6 }
  0x20   : > { %223 = vmatprep.subr.mxu0 %v177_v7 }
  0x21   : > { %224 = vmatpush1.msra.mxu0 %v176_v8 }
  0x22   : > { %225 = vmatprep.subr.mxu0 %v175_v9 }
  0x23   : > { %226 = vmatpush1.msra.mxu0 %v174_v10 }
  0x24   : > { %372 = vmatmul.mubr.msk.f32.vlgmr.msra.gmra.mxu0 %vm184_vm1, %v173_v11 }
  0xe4   : > { %v261_v12 = vpop.f32.mrf.mxu0 }
  0xe5   : > { %v266_v13 = vmax.f32 %v261_v12, 0.0 }
  0xe6   : > { %v263_v14 = vpop.f32.mrf.mxu0 }
  0xe7   : > { %268 = vst [vmem:[%s161_s5] sm:$0xff] %v266_v13  ;;  %v267_v15 = vmax.f32 %v263_v14, 0.0 }
  0xe9   : > { %269 = vst [vmem:[%s161_s5 + $0x8] sm:$0xff] %v267_v15 }
  0xea   : > { %449 = shalt.err (!%p446_p5)
}
  0xeb   : > { %s450_s24 = scalar_lea.hbm %s285_s15, 256  ;;  %s454_s27 = scalar_lea.hbm %s635_s2, 512 }
  0xec   : > { %p451_p6 = scmp.ne.s32.totalorder %s285_s15, %s450_s24  ;;  %p455_p10 = scmp.lt.s32.totalorder %s285_s15, %s635_s2 }
  0xed   : > { %p456_p11 = scmp.lt.s32.totalorder %s454_s27, %s450_s24 }
  0xee   : > { %p452_p7 = pnand %p451_p6, %p571_p4 }
  0xef   : > { %p457_p12 = por %p456_p11, %p455_p10 }
  0xf0   : > { %p453_p9 = pneg %p452_p7 }
  0xf2   : > { %p458_p13 = pnand %p457_p12, %p453_p9 }
  0xf4   : > { %461 = shalt.err (!%p458_p13)
}
  0xf5   : > { %380 = dma.vmem_to_hbm [thread:$0]  (%p571_p4), %s288_s6, 256, %s285_s15, %s271_s16  }
  0xf6 PF: > { %p386_p0 = scmp.ge.s32.totalorder %s512_s14, 2  ;;  %s299_s30 = sand.u32 1, %s492_s9  }
  0xf7   : > { %s300_s3 = scalar_lea.sflag [#allocation3], %s299_s30 }
  0xf8   : > { %p383_p1 = pnand %p386_p0, %p578_p8 }
  0xfa   : > { %p384_p2 = pneg %p383_p1 }
  0xfc   : > { %487 = dma.done.wait (%p384_p2), %s300_s3, 256  }
  0xfd   : > { %489 = vsyncadd (%p384_p2), %s300_s3, 4294967040  ;;  %s15_s14 = sadd.s32 1, %s512_s14   ;;  %s638_s9 = smov %s496_s10 }
  0xfe   : > { %p12_p3 = scmp.ge.s32.totalorder %s15_s14, 4   ;;  %s639_s10 = smov %s500_s11 }
  0xff   : > { %s640_s11 = smov %s584_s22  ;;  %s641_s12 = smov %s508_s13 }
 0x100   : > { %s642_s13 = smov %s644_s17  ;;  %14 = sbr.rel (!%p12_p3) target bundleno = 4 (0x4), region = 63 }
 0x105   :  { %305 = vsyncpa [#allocation3], 1 }
 0x106   :  { %307 = vsyncpa [#allocation3 + $0x1], 1 }

</bundles_post_ra>
